<compile_context>
chip_gen: v5e
topology: v5e:2x2
jax: 0.10.0
libtpu: 0.0.40
codegen_flags: <defaults>
</compile_context>

<pallas_src>
import functools

import jax
import jax.numpy as jnp
from jax.experimental import pallas as pl
from jax.experimental.pallas import tpu as pltpu

# Module-level clamp bounds (matching the PyTorch script's globals).
# clamp_min(0.0) followed by clamp_max(-0.3) makes the output the constant
# -0.3; we keep the module's forward semantics exactly.
CLAMP_MIN = 0.0
CLAMP_MAX = -0.3

_LANES = 128
_SUBLANES = 8


def _conv1x1_clamp_kernel(w_ref, b_ref, x_ref, o_ref, *, cout, cmin, cmax):
    # w_ref, b_ref: (cout,) f32 scalars in SMEM (sreg -> vreg broadcast).
    # x_ref: (tile_r, 128) sublane+lane-dense pixel slab.
    # o_ref: (cout, tile_r, 128) — full (8,128)-aligned slabs per channel.
    x = x_ref[...]
    chans = []
    for co in range(cout):                        # static unroll (cout == 2)
        y = x * w_ref[co] + b_ref[co]             # VPU scalar-broadcast FMA
        y = jnp.maximum(y, cmin)                  # torch.clamp_min
        y = jnp.minimum(y, cmax)                  # torch.clamp_max
        chans.append(y.astype(o_ref.dtype))
    o_ref[...] = jnp.stack(chans, axis=0)         # single full-width store


def conv1x1_stride2_clamp(x_nchw, weight, bias,
                          clamp_min=CLAMP_MIN, clamp_max=CLAMP_MAX,
                          allow_constant_fastpath=True):
    """x_nchw: (N, 1, H, W); weight: (Cout, 1, 1, 1); bias: (Cout,)."""
    N, Cin, H, W = x_nchw.shape
    assert Cin == 1, "kernel specialized for Conv2d(in_channels=1, ...)"
    Cout = weight.shape[0]

    # stride-2, padding-0, 1x1 conv == spatial subsample + per-pixel scale.
    # TODO(synk): fuse this strided subsample into the pallas_call index_map
    #             so the wrapper slice/pad HBM passes disappear at scale.
    xs = x_nchw[:, 0, ::2, ::2]                   # (N, Ho, Wo), contiguous
    Ho, Wo = xs.shape[1], xs.shape[2]

    if allow_constant_fastpath and clamp_min >= clamp_max:
        # clamp_max(clamp_min(x, m), M) with m >= M is identically M:
        # output is a compile-time constant -> write-only fill, no input read.
        return jnp.full((N, Cout, Ho, Wo), clamp_max, dtype=x_nchw.dtype)

    # Per-image pixel slab: pad Ho*Wo up to a multiple of 8*128 and reshape to
    # (R, 128) so pixels occupy full sublanes AND lanes of every vreg.
    P = Ho * Wo
    P_pad = -(-P // (_SUBLANES * _LANES)) * (_SUBLANES * _LANES)
    R = P_pad // _LANES                           # rows per image, multiple of 8

    xp = xs.reshape(N, P)
    if P_pad != P:
        xp = jnp.pad(xp, ((0, 0), (0, P_pad - P)))
    xp = xp.reshape(N, R, _LANES)

    # Largest row tile (multiple of 8) dividing R, capped at 2048 rows:
    # double-buffered footprint = 2 * (1 + Cout) * tile_r * 128 * 4 B
    # (<= ~6.3 MiB at the cap) — safely inside the 32 MiB scoped-VMEM default
    # on v5e/v6e and v7x's smaller physical VMEM.
    tile_r = _SUBLANES
    for cand in (2048, 1024, 512, 256, 128, 64, 32, 16, 8):
        if R % cand == 0:
            tile_r = cand
            break

    w = weight.reshape(Cout).astype(jnp.float32)  # Cin == 1, 1x1 kernel
    b = bias.reshape(Cout).astype(jnp.float32)

    kernel = functools.partial(
        _conv1x1_clamp_kernel,
        cout=Cout,
        cmin=float(clamp_min),
        cmax=float(clamp_max),
    )

    out = pl.pallas_call(
        kernel,
        out_shape=jax.ShapeDtypeStruct((N, Cout, R, _LANES), x_nchw.dtype),
        grid=(N, R // tile_r),
        in_specs=[
            pl.BlockSpec(memory_space=pltpu.MemorySpace.SMEM),    # weights
            pl.BlockSpec(memory_space=pltpu.MemorySpace.SMEM),    # bias
            pl.BlockSpec((None, tile_r, _LANES),
                         lambda n, r: (n, r, 0)),                 # pixels
        ],
        out_specs=pl.BlockSpec((None, Cout, tile_r, _LANES),
                               lambda n, r: (n, 0, r, 0)),
        compiler_params=pltpu.CompilerParams(
            dimension_semantics=("parallel", "parallel")),
    )(w, b, xp)

    # (N, Cout, R, 128) -> (N, Cout, P_pad) -> NCHW.  No transpose needed;
    # padded pixels are sliced off (they were never part of the real output).
    out = out.reshape(N, Cout, P_pad)[:, :, :P].reshape(N, Cout, Ho, Wo)
    return out


def _reference(x, weight, bias, cmin, cmax):
    cout = weight.shape[0]
    ref = jnp.einsum("nchw,oc->nohw", x[:, :, ::2, ::2], weight.reshape(cout, 1))
    ref = ref + bias.reshape(1, cout, 1, 1)
    return jnp.minimum(jnp.maximum(ref, cmin), cmax)


if __name__ == "__main__":
    key = jax.random.PRNGKey(0)
    kx, kw, kb = jax.random.split(key, 3)

    # Input consistent with Conv2d(in_channels=1): small NCHW batch.
    x = jax.random.normal(kx, (2, 1, 16, 16), dtype=jnp.float32)

    # Deterministic parameter init (Conv2d(1, 2, kernel_size=1, stride=2)).
    weight = jax.random.normal(kw, (2, 1, 1, 1), dtype=jnp.float32) * 0.5
    bias = jax.random.normal(kb, (2,), dtype=jnp.float32) * 0.1

    ref = _reference(x, weight, bias, CLAMP_MIN, CLAMP_MAX)

    # 1) Module-default bounds via the constant-fill fast path
    #    (clamp chain collapses the output to -0.3).
    y = conv1x1_stride2_clamp(x, weight, bias)
    jax.block_until_ready(y)
    assert y.shape == (2, 2, 8, 8)
    assert jnp.allclose(y, ref, atol=1e-5, rtol=1e-5)

    # 2) Same default bounds but forcing the Pallas kernel path.
    y_k = conv1x1_stride2_clamp(x, weight, bias, allow_constant_fastpath=False)
    jax.block_until_ready(y_k)
    assert jnp.allclose(y_k, ref, atol=1e-5, rtol=1e-5)

    # 3) Wide clamp bounds so the multiply-add path is numerically exercised.
    y_wide = conv1x1_stride2_clamp(x, weight, bias,
                                   clamp_min=-10.0, clamp_max=10.0)
    jax.block_until_ready(y_wide)
    ref_wide = _reference(x, weight, bias, -10.0, 10.0)
    assert jnp.allclose(y_wide, ref_wide, atol=1e-5, rtol=1e-5)

    print("KERNEL_OK")
</pallas_src>

<mosaic_0001>
module attributes {stable_mosaic.version = 11 : i64} {
  func.func @_conv1x1_clamp_kernel(%arg0: i32, %arg1: i32, %arg2: memref<2xf32, #tpu.memory_space<smem>>, %arg3: memref<2xf32, #tpu.memory_space<smem>>, %arg4: memref<1x8x128xf32, #tpu.memory_space<vmem>>, %arg5: memref<1x2x8x128xf32, #tpu.memory_space<vmem>>) attributes {dimension_semantics = [#tpu.dimension_semantics<parallel>, #tpu.dimension_semantics<parallel>], iteration_bounds = array<i64: 2, 1>, scalar_prefetch = 0 : i64, scratch_operands = 0 : i64, tpu.core_type = #tpu.core_type<tc>, window_params = [{transform_indices = @transform_0, window_bounds = array<i64: 2>}, {transform_indices = @transform_1, window_bounds = array<i64: 2>}, {transform_indices = @transform_2, window_bounds = array<i64: 1, 8, 128>}, {transform_indices = @transform_3, window_bounds = array<i64: 1, 2, 8, 128>}]} {
    %c0 = arith.constant 0 : index
    %c0_0 = arith.constant 0 : index
    %c0_1 = arith.constant 0 : index
    %0 = vector.load %arg4[%c0, %c0_0, %c0_1] : memref<1x8x128xf32, #tpu.memory_space<vmem>>, vector<1x8x128xf32>
    %1 = vector.shape_cast %0 : vector<1x8x128xf32> to vector<8x128xf32>
    %c0_2 = arith.constant 0 : index
    %2 = memref.load %arg2[%c0_2] : memref<2xf32, #tpu.memory_space<smem>>
    %3 = vector.broadcast %2 : f32 to vector<8x128xf32>
    %4 = arith.mulf %1, %3 : vector<8x128xf32>
    %c0_3 = arith.constant 0 : index
    %5 = memref.load %arg3[%c0_3] : memref<2xf32, #tpu.memory_space<smem>>
    %6 = vector.broadcast %5 : f32 to vector<8x128xf32>
    %7 = arith.addf %4, %6 : vector<8x128xf32>
    %cst = arith.constant 0.000000e+00 : f32
    %8 = vector.broadcast %cst : f32 to vector<8x128xf32>
    %9 = arith.maximumf %7, %8 : vector<8x128xf32>
    %cst_4 = arith.constant -3.000000e-01 : f32
    %10 = vector.broadcast %cst_4 : f32 to vector<8x128xf32>
    %11 = arith.minimumf %9, %10 : vector<8x128xf32>
    %c1 = arith.constant 1 : index
    %12 = memref.load %arg2[%c1] : memref<2xf32, #tpu.memory_space<smem>>
    %13 = vector.broadcast %12 : f32 to vector<8x128xf32>
    %14 = arith.mulf %1, %13 : vector<8x128xf32>
    %c1_5 = arith.constant 1 : index
    %15 = memref.load %arg3[%c1_5] : memref<2xf32, #tpu.memory_space<smem>>
    %16 = vector.broadcast %15 : f32 to vector<8x128xf32>
    %17 = arith.addf %14, %16 : vector<8x128xf32>
    %cst_6 = arith.constant 0.000000e+00 : f32
    %18 = vector.broadcast %cst_6 : f32 to vector<8x128xf32>
    %19 = arith.maximumf %17, %18 : vector<8x128xf32>
    %cst_7 = arith.constant -3.000000e-01 : f32
    %20 = vector.broadcast %cst_7 : f32 to vector<8x128xf32>
    %21 = arith.minimumf %19, %20 : vector<8x128xf32>
    %22 = vector.shape_cast %11 : vector<8x128xf32> to vector<1x8x128xf32>
    %23 = vector.shape_cast %21 : vector<8x128xf32> to vector<1x8x128xf32>
    %24 = tpu.concatenate %22, %23 in 0 : vector<1x8x128xf32>, vector<1x8x128xf32> -> vector<2x8x128xf32>
    %c0_8 = arith.constant 0 : index
    %c0_9 = arith.constant 0 : index
    %c0_10 = arith.constant 0 : index
    %c0_11 = arith.constant 0 : index
    %25 = vector.load %arg5[%c0_8, %c0_9, %c0_10, %c0_11] : memref<1x2x8x128xf32, #tpu.memory_space<vmem>>, vector<1x2x8x128xf32>
    %26 = vector.shape_cast %25 : vector<1x2x8x128xf32> to vector<2x8x128xf32>
    %27 = vector.shape_cast %24 : vector<2x8x128xf32> to vector<1x2x8x128xf32>
    tpu.vector_store %arg5[%c0_8, %c0_9, %c0_10, %c0_11], %27 {strides = array<i32>} : memref<1x2x8x128xf32, #tpu.memory_space<vmem>>, vector<1x2x8x128xf32>,
    return
  }
  func.func @transform_0(%arg0: i32, %arg1: i32) -> i32 {
    %c0_i32 = arith.constant 0 : i32
    %c0_i32_0 = arith.constant 0 : i32
    return %c0_i32 : i32
  }
  func.func @transform_1(%arg0: i32, %arg1: i32) -> i32 {
    %c0_i32 = arith.constant 0 : i32
    %c0_i32_0 = arith.constant 0 : i32
    return %c0_i32 : i32
  }
  func.func @transform_2(%arg0: i32, %arg1: i32) -> (i32, i32, i32) {
    %c0_i32 = arith.constant 0 : i32
    %c0_i32_0 = arith.constant 0 : i32
    return %arg0, %arg1, %c0_i32 : i32, i32, i32
  }
  func.func @transform_3(%arg0: i32, %arg1: i32) -> (i32, i32, i32, i32) {
    %c0_i32 = arith.constant 0 : i32
    %c0_i32_0 = arith.constant 0 : i32
    %c0_i32_1 = arith.constant 0 : i32
    return %arg0, %c0_i32, %arg1, %c0_i32_0 : i32, i32, i32, i32
  }
}

</mosaic_0001>

<bundles_post_ra>
// kernel: tpu_custom_call.1
= control target key start
LH: loop header
LB: loop body
LE: loop exit
PB: predicated region body
PF: predicated region fallthrough
CT: control target
= control target key end

     0   :  { %8 = vsyncpa [#allocation5], 0  ;;  %s803_s0 = inlined_call_operand.hbm [shape: f32[2], index: 0, kind: input, shape index: {}]   ;;  %s804_s1 = inlined_call_operand.hbm [shape: f32[2], index: 1, kind: input, shape index: {}]   ;;  %s805_s2 = inlined_call_operand.hbm [shape: f32[2,8,128], index: 2, kind: input, shape index: {}]   ;;  %s806_s3 = inlined_call_operand.hbm [shape: f32[2,2,8,128], index: 3, kind: output, shape index: {}]  }
   0x1   :  { %9 = vsyncpa [#allocation7], 0 }
   0x2   :  { %10 = vsyncpa [#allocation3], 0 }
   0x3   :  { %12 = vsyncpa [#allocation3 + $0x1], 0 }
   0x4   :  { %13 = vsyncpa [#allocation4], 0 }
   0x5   :  { %15 = vsyncpa [#allocation4 + $0x1], 0  ;;  %s656_s12 = smov 0   ;;  %s658_s13 = smov 0  }
   0x6   :  { %s660_s14 = smov 0   ;;  %s662_s15 = smov 0  }
   0x7   :  { %s664_s16 = smov 0   ;;  %s666_s17 = smov 0  }
   0x8 LB: > { %s374_s18 = sadd.s32 4294967295, %s630_s17   ;;  %s375_s19 = sadd.s32 4294967294, %s630_s17   ;;  %s630_s17 = sphi %s666_s17, %s21_s17   ;;  %s626_s16 = sphi %s664_s16, %s816_s16   ;;  %s622_s15 = sphi %s662_s15, %s815_s15   ;;  %s618_s14 = sphi %s660_s14, %s814_s14   ;;  %s614_s13 = sphi %s658_s13, %s813_s13   ;;  %s610_s12 = sphi %s656_s12, %s812_s12  }
   0x9   : > { %p97_p0 = scmp.ne.s32.totalorder %s614_s13, %s610_s12  ;;  %p690_p1 = scmp.eq.s32.totalorder %s374_s18, 0 }
   0xa   : > { %p129_p2 = scmp.eq.s32.totalorder %s375_s19, 1  ;;  %p376_p4 = scmp.ge.s32.totalorder %s630_s17, 1 }
   0xb   : > { %p696_p3 = por %p690_p1, %p97_p0  ;;  %p136_p6 = scmp.lt.s32.totalorder %s630_s17, 3 }
   0xc   : > { %p701_p5 = por %p129_p2, %p97_p0  ;;  %s148_s25 = sshll.u32 %s803_s0, 4  ;;  %s149_s25 = int_to_ptr.hbm [resolvable:$true] %s148_s25 }
   0xd   : > { %p709_p7 = pnand %p376_p4, %p136_p6  ;;  %p379_p8 = scmp.ge.s32.totalorder %s630_s17, 2 }
   0xe   : > { %s158_s29 = sshll.u32 %s804_s1, 4  ;;  %s632_s30 = smov [#allocation2]   ;;  %s159_s29 = int_to_ptr.hbm [resolvable:$true] %s158_s29 }
   0xf   : > { %p407_p9 = pneg %p709_p7  ;;  %s633_s4 = smov [#allocation6]  }
  0x10   : > { %p123_p11 = scmp.eq.s32.totalorder %s374_s18, 1  ;;  %s33_s5 = sadd.s32 1, %s626_s16 }
  0x11   : > { %p408_p10 = pnand %p407_p9, %p690_p1  ;;  %p35_p12 = scmp.ge.s32.totalorder %s33_s5, 2 }
  0x12   : > { %s84_s6 = sadd.s32 1, %s618_s14  ;;  %p91_p13 = scmp.ne.s32.totalorder %s618_s14, %s614_s13 }
  0x13   : > { %410 = dma.hbm_to_smem (!%p408_p10), %s149_s25, 16, %s632_s30, [#allocation5]  }
  0x14   : > { %413 = dma.hbm_to_smem (!%p408_p10), %s159_s29, 16, %s633_s4, [#allocation7]  }
  0x15   : > { %p92_p0 = scmp.eq.s32.totalorder %s630_s17, 0  ;;  %s818_s5 = smov (%p35_p12, %s33_s5), 0 }
  0x16   : > { %p728_p2 = por %p123_p11, %p91_p13  ;;  %p424_p4 = scmp.lt.s32.totalorder %s630_s17, 2 }
  0x17   : > { %s79_s8 = ssub.s32 %s626_s16, %s818_s5  ;;  %s169_s9 = sand.u32 1, %s618_s14  }
  0x18   : > { %p82_p6 = scmp.eq.s32.totalorder %s79_s8, 0  ;;  %p93_p9 = por %p92_p0, %p91_p13 }
  0x19   : > { %s380_s10 = sshll.u32 %s169_s9, 3  ;;  %s381_s11 = sshll.u32 %s626_s16, 3 }
  0x1a   : > { %s738_s18 = scalar_select %p82_p6, %s618_s14, %s84_s6  }
  0x1b   : > { %s178_s24 = scalar_lea.hbm %s805_s2, %s381_s11  ;;  %s173_s27 = scalar_lea.vmem [#allocation8], %s380_s10 }
  0x1c   : > { %s180_s25 = sshll.u32 %s178_s24, 4  ;;  %s182_s28 = sshll.u32 %s173_s27, 4  ;;  %s181_s25 = int_to_ptr.hbm [resolvable:$true] %s180_s25  ;;  %s183_s28 = int_to_ptr.vmem [resolvable:$true] %s182_s28 }
  0x1d   : > { %p415_p10 = pnand %p424_p4, %p93_p9  ;;  %s170_s29 = scalar_lea.sflag [#allocation3], %s169_s9 }
  0x1e   : > { %191 = sbr.rel (%p709_p7) target bundleno = 65 (0x41), region = 32 }
  0x1f   : > { %417 = dma.hbm_to_vmem [thread:$0]  (!%p415_p10), %s181_s25, 128, %s183_s28, %s170_s29  }
  0x23   : > { %593 = dma.done.wait (%p690_p1), [#allocation5], 16  }
  0x24   : > { %595 = vsyncadd (%p690_p1), [#allocation5], 4294967280 }
  0x25   : > { %597 = dma.done.wait (%p690_p1), [#allocation7], 16  }
  0x26   : > { %599 = vsyncadd (%p690_p1), [#allocation7], 4294967280  ;;  %s756_s30 = sand.u32 1, %s614_s13  }
  0x27   : > { %s385_s26 = sshll.u32 %s756_s30, 3  ;;  %s204_s4 = scalar_lea.sflag [#allocation3], %s756_s30 }
  0x28   : > { %s207_s6 = scalar_lea.vmem [#allocation8], %s385_s26 }
  0x29   : > { %601 = dma.done.wait (%p696_p3), %s204_s4, 128  }
  0x2a   : > { %603 = vsyncadd (%p696_p3), %s204_s4, 4294967168 }
  0x2b   : > { %213 = sfence }
  0x2c   : > { %s233_s8 = sld [smem:[#allocation2]]  ;;  %s386_s11 = sshll.u32 %s756_s30, 4  ;;  %v232_v0 = vld [vmem:[%s207_s6] sm:$0xff] }
  0x2d   : > { %s236_s20 = sld [smem:[#allocation6]]  ;;  %s394_s19 = sshll.u32 %s622_s15, 4 }
  0x2e   : > { %s387_s9 = sld [smem:[#allocation2 + $0x1]]  ;;  %s264_s24 = scalar_lea.hbm %s806_s3, %s394_s19 }
  0x2f   : > { %s388_s10 = sld [smem:[#allocation6 + $0x1]]  ;;  %s231_s25 = scalar_lea.vmem [#allocation9], %s386_s11 }
  0x30   : > { %s265_s27 = sshll.u32 %s231_s25, 4  ;;  %s267_s28 = sshll.u32 %s264_s24, 4  ;;  %s266_s27 = int_to_ptr.vmem [resolvable:$true] %s265_s27  ;;  %s268_s28 = int_to_ptr.hbm [resolvable:$true] %s267_s28 }
  0x31   : > { %s252_s15 = scalar_lea.sflag [#allocation4], %s756_s30  ;;  %s554_s29 = sshra.s32 %s268_s28, 4  ;;  %s555_s29 = int_to_ptr.hbm [resolvable:$true] %s554_s29 }
  0x32   : > { %v234_v1 = vstv %s233_s8  ;;  %s556_s26 = scalar_lea.hbm %s555_s29, 16  ;;  %s560_s8 = scalar_lea.hbm %s806_s3, 32 }
  0x33   : > { %v235_v2 = vmul.f32 %v234_v1, %v232_v0  ;;  %v237_v3 = vstv %s236_s20  ;;  %p557_p1 = scmp.ne.s32.totalorder %s555_s29, %s556_s26  ;;  %p561_p11 = scmp.lt.s32.totalorder %s555_s29, %s806_s3 }
  0x34   : > { %v242_v4 = vstv %s387_s9  ;;  %p562_p12 = scmp.lt.s32.totalorder %s560_s8, %s556_s26 }
  0x35   : > { %v238_v5 = vadd.f32 %v237_v3, %v235_v2  ;;  %v243_v6 = vmul.f32 %v242_v4, %v232_v0  ;;  %v245_v7 = vstv %s388_s10  ;;  %p558_p3 = pnand %p557_p1, %p728_p2 }
  0x36   : > { %p563_p13 = por %p562_p12, %p561_p11 }
  0x37   : > { %v239_v8 = vmax.f32 %v238_v5, 0.0  ;;  %v246_v9 = vadd.f32 %v245_v7, %v243_v6  ;;  %p559_p7 = pneg %p558_p3 }
  0x39   : > { %v240_v10 = vmin.f32 %v239_v8, -0.3  ;;  %v247_v11 = vmax.f32 %v246_v9, 0.0  ;;  %p564_p0 = pnand %p563_p13, %p559_p7 }
  0x3b   : > { %249 = vst [vmem:[%s231_s25] sm:$0xff] %v240_v10  ;;  %v248_v12 = vmin.f32 %v247_v11, -0.3 }
  0x3d   : > { %250 = vst [vmem:[%s231_s25 + $0x8] sm:$0xff] %v248_v12 }
  0x3e   : > { %567 = shalt.err (!%p564_p0)
}
  0x3f   : > { %s634_s30 = smov 128   ;;  %s635_s10 = smov 8  }
  0x40   : > { %405 = dma.vmem_to_hbm [thread:$0]  (%p728_p2), %s266_s27, 256, %s268_s28, %s252_s15, %s634_s30, %s634_s30, %s635_s10  }
  0x41 PF: > { %s282_s11 = sand.u32 1, %s610_s12   ;;  %p419_p4 = pnand %p379_p8, %p701_p5 }
  0x42   : > { %s283_s19 = scalar_lea.sflag [#allocation4], %s282_s11 }
  0x43   : > { %p420_p6 = pneg %p419_p4 }
  0x45   : > { %605 = dma.done.wait (%p420_p6), %s283_s19, 256  }
  0x46   : > { %607 = vsyncadd (%p420_p6), %s283_s19, 4294967040  ;;  %s21_s17 = sadd.s32 1, %s630_s17   ;;  %s812_s12 = smov %s614_s13 }
  0x47   : > { %p18_p9 = scmp.ge.s32.totalorder %s21_s17, 4   ;;  %s813_s13 = smov %s618_s14 }
  0x48   : > { %s814_s14 = smov %s738_s18  ;;  %s815_s15 = smov %s626_s16 }
  0x49   : > { %s816_s16 = smov %s818_s5  ;;  %20 = sbr.rel (!%p18_p9) target bundleno = 8 (0x8), region = 86 }
  0x4e   :  { %289 = vsyncpa [#allocation3], 1 }
  0x4f   :  { %291 = vsyncpa [#allocation3 + $0x1], 1 }
  0x50   :  { %292 = vsyncpa [#allocation4], 1 }
  0x51   :  { %294 = vsyncpa [#allocation4 + $0x1], 1 }
  0x52   :  { %295 = vsyncpa [#allocation5], 1 }
  0x53   :  { %297 = vsyncpa [#allocation5 + $0x1], 1 }
  0x54   :  { %298 = vsyncpa [#allocation7], 1 }

</bundles_post_ra>
